<compile_context>
chip_gen: v7x
topology: tpu7x:2x2x1
jax: 0.10.0
libtpu: 0.0.40
codegen_flags: <defaults>
</compile_context>

<pallas_src>
import functools

import jax
import jax.numpy as jnp
import numpy as np
from jax.experimental import pallas as pl
from jax.experimental.pallas import tpu as pltpu


def _round_up(a, b):
    return (a + b - 1) // b * b


# ----------------------------------------------------------------------------
# Pallas kernel: out = relu(x @ w + b)   (BN folded into w/b)
#   x: (TM, K)  bf16    w: (K, Np) bf16    b: (1, Np) f32    out: (TM, Np) f32
# ----------------------------------------------------------------------------
def _focus_conv_kernel(x_ref, w_ref, b_ref, o_ref):
    acc = jnp.dot(x_ref[...], w_ref[...], preferred_element_type=jnp.float32)
    acc = acc + b_ref[...]
    o_ref[...] = jnp.maximum(acc, 0.0)


def focus_conv_matmul(x2d_bf16, w_bf16, b_f32):
    """Fused 1x1x1-conv + folded-BN + ReLU as a tiled MXU matmul."""
    M, K = x2d_bf16.shape
    Kw, Np = w_bf16.shape
    assert Kw == K and Np % 128 == 0

    # M tile: multiple of 8 (sublane); 256 gives >=2 parallel grid units at the
    # example shapes so both TensorCores on v7x are used.
    TM = min(256, _round_up(max(M, 1), 8))
    grid_m = pl.cdiv(M, TM)

    cost = pl.CostEstimate(
        flops=2 * M * K * Np,
        transcendentals=0,
        bytes_accessed=M * K * 2 + K * Np * 2 + Np * 4 + M * Np * 4,
    )

    return pl.pallas_call(
        _focus_conv_kernel,
        out_shape=jax.ShapeDtypeStruct((M, Np), jnp.float32),
        grid=(grid_m,),
        in_specs=[
            pl.BlockSpec((TM, K), lambda i: (i, 0)),   # K == full extent (no pad)
            pl.BlockSpec((K, Np), lambda i: (0, 0)),   # weights resident
            pl.BlockSpec((1, Np), lambda i: (0, 0)),   # folded bias resident
        ],
        out_specs=pl.BlockSpec((TM, Np), lambda i: (i, 0)),
        compiler_params=pltpu.CompilerParams(
            dimension_semantics=("parallel",),
            # tiles here are <1 MiB; 32 MiB keeps the budget portable to v7x
            # (64 MiB physical) while leaving double-buffering headroom.
            vmem_limit_bytes=32 * 1024 * 1024,
        ),
        cost_estimate=cost,
    )(x2d_bf16, w_bf16, b_f32)


# ----------------------------------------------------------------------------
# Focus forward (NDHWC)
# ----------------------------------------------------------------------------
# PyTorch cat order (d,h,w offsets): (0,0,0),(1,0,0),(0,1,0),(0,0,1),
#                                    (1,1,0),(1,0,1),(0,1,1),(1,1,1)
_FOCUS_OFFSETS = [(0, 0, 0), (1, 0, 0), (0, 1, 0), (0, 0, 1),
                  (1, 1, 0), (1, 0, 1), (0, 1, 1), (1, 1, 1)]


def _space_to_depth(x_ndhwc):
    slices = [x_ndhwc[:, d::2, h::2, w::2, :] for (d, h, w) in _FOCUS_OFFSETS]
    return jnp.concatenate(slices, axis=-1)   # [N, D/2, H/2, W/2, 8*C]


def focus_forward(x_ndhwc, w_bf16, b_f32, *, c2):
    N, D, H, W, C = x_ndhwc.shape
    Do, Ho, Wo = D // 2, H // 2, W // 2
    cat = _space_to_depth(x_ndhwc)                     # size-preserving permutation
    x2d = cat.reshape(N * Do * Ho * Wo, 8 * C).astype(jnp.bfloat16)
    out2d = focus_conv_matmul(x2d, w_bf16, b_f32)      # [M, Np] f32
    return out2d[:, :c2].reshape(N, Do, Ho, Wo, c2)


def focus_reference(x_ndhwc, w_f32, b_f32):
    """Pure-JAX f32 reference with identical semantics (for the sanity check)."""
    cat = _space_to_depth(x_ndhwc)
    out = jnp.einsum("ndhwk,kc->ndhwc", cat, w_f32) + b_f32
    return jnp.maximum(out, 0.0)


# ----------------------------------------------------------------------------
# Deterministic parameters with BN folded (inference semantics, eps=1e-3)
# ----------------------------------------------------------------------------
def make_focus_params(key, c1, c2):
    kw, kg, kb, km, kv = jax.random.split(key, 5)
    k_in = 8 * c1
    # Conv3d(c1*8, c2, 1, 1, bias=False) weight, reshaped to [8*c1, c2]; the
    # input-channel axis is offset-major in the same order as the torch.cat.
    w = jax.random.normal(kw, (k_in, c2), jnp.float32) / np.sqrt(k_in)
    gamma = jax.random.uniform(kg, (c2,), minval=0.5, maxval=1.5)
    beta = jax.random.normal(kb, (c2,)) * 0.1
    mean = jax.random.normal(km, (c2,)) * 0.1
    var = jax.random.uniform(kv, (c2,), minval=0.5, maxval=1.5)
    eps = 1e-3  # BatchNorm3d(eps=0.001)
    s = gamma / jnp.sqrt(var + eps)
    w_fold = w * s[None, :]
    b_fold = beta - mean * s

    # Pad to lane-dense Np once at build time (no per-call pad/slice copies).
    Np = _round_up(c2, 128)
    w_pad = jnp.pad(w_fold, ((0, 0), (0, Np - c2))).astype(jnp.bfloat16)
    b_pad = jnp.pad(b_fold, (0, Np - c2)).reshape(1, Np).astype(jnp.float32)
    return {"w_pad": w_pad, "b_pad": b_pad, "w_f32": w_fold, "b_f32": b_fold}


# ----------------------------------------------------------------------------
if __name__ == "__main__":
    C1, C2 = 4, 32          # Focus(c1=4, c2=32, k=1, s=1)
    N, D, H, W = 2, 16, 16, 16

    key = jax.random.PRNGKey(0)
    k_in, k_par = jax.random.split(key)

    # PyTorch-style input NCDHW, transposed once to the kernel layout NDHWC.
    x_ncdhw = jax.random.normal(k_in, (N, C1, D, H, W), jnp.float32)
    x = jnp.transpose(x_ncdhw, (0, 2, 3, 4, 1))

    params = make_focus_params(k_par, C1, C2)

    fwd = jax.jit(functools.partial(focus_forward, c2=C2))
    out = fwd(x, params["w_pad"], params["b_pad"])
    out = jax.block_until_ready(out)

    assert out.shape == (N, D // 2, H // 2, W // 2, C2)
    assert bool(jnp.all(jnp.isfinite(out)))

    # Numerical sanity check vs. f32 reference (bf16 operands, f32 accumulation).
    ref = jax.jit(focus_reference)(x, params["w_f32"], params["b_f32"])
    ref = jax.block_until_ready(ref)
    err = float(jnp.max(jnp.abs(out - ref)) / (jnp.max(jnp.abs(ref)) + 1e-6))
    assert err < 2e-2, f"max relative-to-peak error too large: {err}"

    print("KERNEL_OK")
</pallas_src>

<mosaic_0001>
module attributes {stable_mosaic.version = 11 : i64} {
  func.func @_focus_conv_kernel(%arg0: i32, %arg1: memref<256x32xbf16, #tpu.memory_space<vmem>>, %arg2: memref<32x128xbf16, #tpu.memory_space<vmem>>, %arg3: memref<1x128xf32, #tpu.memory_space<vmem>>, %arg4: memref<256x128xf32, #tpu.memory_space<vmem>>) attributes {dimension_semantics = [#tpu.dimension_semantics<parallel>], iteration_bounds = array<i64: 4>, scalar_prefetch = 0 : i64, scratch_operands = 0 : i64, tpu.core_type = #tpu.core_type<tc>, window_params = [{transform_indices = @transform_0, window_bounds = array<i64: 256, 32>}, {pipeline_mode = #tpu.pipeline_mode<synchronous>, transform_indices = @transform_1, window_bounds = array<i64: 32, 128>}, {pipeline_mode = #tpu.pipeline_mode<synchronous>, transform_indices = @transform_2, window_bounds = array<i64: 1, 128>}, {transform_indices = @transform_3, window_bounds = array<i64: 256, 128>}]} {
    %c0 = arith.constant 0 : index
    %c0_0 = arith.constant 0 : index
    %0 = vector.load %arg1[%c0, %c0_0] : memref<256x32xbf16, #tpu.memory_space<vmem>>, vector<256x32xbf16>
    %c0_1 = arith.constant 0 : index
    %c0_2 = arith.constant 0 : index
    %1 = vector.load %arg2[%c0_1, %c0_2] : memref<32x128xbf16, #tpu.memory_space<vmem>>, vector<32x128xbf16>
    %cst = arith.constant dense<0.000000e+00> : vector<256x128xf32>
    %2 = tpu.matmul %0, %1, %cst {dimension_numbers = #tpu.dot_dimension_numbers<[1], [0], [0], [1], [0, 0, 1, 1], [], []>} : vector<256x32xbf16>, vector<32x128xbf16>, vector<256x128xf32> -> vector<256x128xf32>
    %c0_3 = arith.constant 0 : index
    %c0_4 = arith.constant 0 : index
    %3 = vector.load %arg3[%c0_3, %c0_4] : memref<1x128xf32, #tpu.memory_space<vmem>>, vector<1x128xf32>
    %4 = vector.broadcast %3 : vector<1x128xf32> to vector<256x128xf32>
    %5 = arith.addf %2, %4 : vector<256x128xf32>
    %cst_5 = arith.constant 0.000000e+00 : f32
    %6 = vector.broadcast %cst_5 : f32 to vector<256x128xf32>
    %7 = arith.maximumf %5, %6 : vector<256x128xf32>
    %c0_6 = arith.constant 0 : index
    %c0_7 = arith.constant 0 : index
    %8 = vector.load %arg4[%c0_6, %c0_7] : memref<256x128xf32, #tpu.memory_space<vmem>>, vector<256x128xf32>
    tpu.vector_store %arg4[%c0_6, %c0_7], %7 {strides = array<i32>} : memref<256x128xf32, #tpu.memory_space<vmem>>, vector<256x128xf32>,
    return
  }
  func.func @transform_0(%arg0: i32) -> (i32, i32) {
    %c0_i32 = arith.constant 0 : i32
    %c0_i32_0 = arith.constant 0 : i32
    return %arg0, %c0_i32 : i32, i32
  }
  func.func @transform_1(%arg0: i32) -> (i32, i32) {
    %c0_i32 = arith.constant 0 : i32
    %c0_i32_0 = arith.constant 0 : i32
    %c0_i32_1 = arith.constant 0 : i32
    return %c0_i32, %c0_i32_0 : i32, i32
  }
  func.func @transform_2(%arg0: i32) -> (i32, i32) {
    %c0_i32 = arith.constant 0 : i32
    %c0_i32_0 = arith.constant 0 : i32
    %c0_i32_1 = arith.constant 0 : i32
    return %c0_i32, %c0_i32_0 : i32, i32
  }
  func.func @transform_3(%arg0: i32) -> (i32, i32) {
    %c0_i32 = arith.constant 0 : i32
    %c0_i32_0 = arith.constant 0 : i32
    return %arg0, %c0_i32 : i32, i32
  }
}

</mosaic_0001>

<bundles_post_ra>
// kernel: focus_forward.1
= control target key start
LH: loop header
LB: loop body
LE: loop exit
PB: predicated region body
PF: predicated region fallthrough
CT: control target
= control target key end

     0   :  { %8 = vsyncpa [#allocation3], 0  ;;  %s1128_s0 = inlined_call_operand.vmem [shape: bf16[1024,32], index: 0, kind: input, shape index: {}]   ;;  %s1129_s1 = inlined_call_operand.vmem [shape: bf16[32,128], index: 1, kind: input, shape index: {}]   ;;  %s1130_s2 = inlined_call_operand.vmem [shape: f32[1,128], index: 2, kind: input, shape index: {}]   ;;  %s1131_s3 = inlined_call_operand.hbm [shape: f32[1024,128], index: 3, kind: output, shape index: {}]  }
   0x1   :  { %10 = vsyncpa [#allocation3 + $0x1], 0  ;;  %s910_s12 = smov 0   ;;  %s912_s13 = smov 0  }
   0x2   :  { %s914_s14 = smov 0   ;;  %s916_s15 = smov 0  }
   0x3 LB: > { %s931_s16 = sadd.s32 4294967295, %s885_s15   ;;  %s658_s17 = sadd.s32 4294967294, %s885_s15   ;;  %s885_s15 = sphi %s916_s15, %s1137_s15   ;;  %s881_s14 = sphi %s914_s14, %s1136_s14   ;;  %s877_s13 = sphi %s912_s13, %s1135_s13   ;;  %s873_s12 = sphi %s910_s12, %s1134_s12  }
   0x4   : > { %s935_s18 = sadd.s32 1, %s885_s15   ;;  %s91_s19 = sadd.s32 1, %s881_s14 }
   0x5   : > { %s88_s20 = ssub.s32 %s885_s15, %s935_s18  ;;  %p101_p0 = scmp.ne.s32.totalorder %s881_s14, %s877_s13 }
   0x6   : > { %p89_p1 = scmp.eq.s32.totalorder %s88_s20, 0  ;;  %p102_p2 = scmp.eq.s32.totalorder %s931_s16, 3 }
   0x7   : > { %p107_p3 = scmp.ne.s32.totalorder %s877_s13, %s873_s12  ;;  %p108_p4 = scmp.eq.s32.totalorder %s658_s17, 3 }
   0x8   : > { %s946_s21 = scalar_select %p89_p1, %s881_s14, %s91_s19  }
   0x9   : > { %p948_p5 = por %p102_p2, %p101_p0  ;;  %p952_p6 = por %p108_p4, %p107_p3 }
   0xa   : > { %p661_p7 = scmp.ge.s32.totalorder %s885_s15, 1  ;;  %p141_p8 = scmp.lt.s32.totalorder %s885_s15, 5 }
   0xc   : > { %p142_p9 = pnand %p661_p7, %p141_p8 }
   0xd   : > { %v805_v0 = vld [vmem:[%s1129_s1] sm:$0xff] (!%p142_p9)   ;;  %s663_s26 = sshll.u32 (!%p142_p9), %s931_s16, 5  ;;  %v806_v1 = vld [vmem:[%s1129_s1 + $0x8] sm:$0xff] (!%p142_p9)   ;;  %vm308_vm0 = vcmask (!%p142_p9), 261120   ;;  %s162_s6 = sand.u32 (!%p142_p9), 1, %s877_s13  }
   0xe   : > { %145 = sbr.rel (%p142_p9) target bundleno = 285 (0x11d), region = 32  ;;  %p166_p10 = scmp.lt.s32.totalorder (!%p142_p9), %s663_s26, 127  ;;  %724 = vmatprep.subr.bf16.mxu0 (!%p142_p9), %v805_v0  ;;  %760 = vmatprep.subr.bf16.mxu1 (!%p142_p9), %v805_v0  ;;  %v1006_v18 = vld [vmem:[%s1130_s2] ss:$0 sm:$0xff] (!%p142_p9) }
   0xf   : > { %725 = vmatpush3.bf16.msra.mxu0 (!%p142_p9), %v805_v0  ;;  %762 = vmatpush3.bf16.msra.mxu1 (!%p142_p9), %v805_v0  ;;  %s662_s9 = sshll.u32 (!%p142_p9), %s162_s6, 8  ;;  %s705_s11 = sshll.u32 (!%p142_p9), %s931_s16, 12 }
  0x10   : > { %726 = vmatprep.subr.bf16.mxu0 (!%p142_p9), %v806_v1  ;;  %761 = vmatprep.subr.bf16.mxu1 (!%p142_p9), %v806_v1  ;;  %s1017_s10 = scalar_lea.vmem (!%p142_p9), [#allocation2], %s662_s9  ;;  %s1076_s20 = scalar_lea.hbm (!%p142_p9), %s1131_s3, %s705_s11 }
  0x11   : > { %s596_s17 = sshll.u32 (!%p142_p9), %s1017_s10, 4  ;;  %s1087_s24 = scalar_lea.sflag (!%p142_p9), [#allocation3], %s162_s6  ;;  %s1078_s17 = int_to_ptr.vmem [resolvable:$true] %s596_s17 }
  0x12   : > { %s823_s25 = scalar_lea.vmem (!%p142_p9), %s1078_s17, 4096 }
  0x13   : > { %727 = vmatpush3.bf16.msra.mxu0 (!%p142_p9), %v806_v1  ;;  %763 = vmatpush3.bf16.msra.mxu1 (!%p142_p9), %v806_v1  ;;  %p824_p11 = scmp.ne.s32.totalorder (!%p142_p9), %s1078_s17, %s823_s25 }
  0x15   : > { %s1139_s26 = smov (!%p166_p10, %s663_s26), 127  ;;  %p825_p12 = pnand %p824_p11, %p948_p5 }
  0x16   : > { %s664_s29 = sshll.u32 %s1139_s26, 2  ;;  %s887_s26 = smov [#allocation2]  }
  0x17   : > { %s968_s5 = scalar_lea.vmem %s1128_s0, %s664_s29  ;;  %p826_p13 = pneg %p825_p12 }
  0x18   : > { %v807_v2 = vld [vmem:[%s968_s5] sm:$0xff]   ;;  %v809_v4 = vld [vmem:[%s968_s5 + $0x8] sm:$0xff]   ;;  %v811_v6 = vld [vmem:[%s968_s5 + $0x10] sm:$0xff]   ;;  %s827_s27 = sshll.u32 %s887_s26, 4  ;;  %s828_s27 = int_to_ptr.vmem [resolvable:$false] %s827_s27 }
  0x19   : > { %v808_v3 = vld [vmem:[%s968_s5 + $0x40] sm:$0xff]   ;;  %728 = vmatprep.mubr.msk.bf16.mxu0 %vm308_vm0, %v807_v2  ;;  %v810_v5 = vld [vmem:[%s968_s5 + $0x48] sm:$0xff]   ;;  %v812_v7 = vld [vmem:[%s968_s5 + $0x50] sm:$0xff]   ;;  %s829_s28 = scalar_lea.vmem %s828_s27, 8192  ;;  %p830_p0 = scmp.lt.s32.totalorder %s1078_s17, %s828_s27 }
  0x1a   : > { %744 = vmatprep.mubr.msk.bf16.mxu1 %vm308_vm0, %v808_v3  ;;  %729 = vmatmul.mubr.msk.bf16.vlgmr.msra.gmra.mrb[0].mxu0 %vm308_vm0, %v809_v4  ;;  %v813_v8 = vld [vmem:[%s968_s5 + $0x18] sm:$0xff]   ;;  %v815_v10 = vld [vmem:[%s968_s5 + $0x20] sm:$0xff]   ;;  %v817_v12 = vld [vmem:[%s968_s5 + $0x28] sm:$0xff]   ;;  %p831_p1 = scmp.lt.s32.totalorder %s829_s28, %s823_s25 }
  0x1b   : > { %745 = vmatmul.mubr.msk.bf16.vlgmr.msra.gmra.mrb[0].mxu1 %vm308_vm0, %v810_v5  ;;  %732 = vmatprep.mubr.msk.bf16.mxu0 %vm308_vm0, %v811_v6  ;;  %v814_v9 = vld [vmem:[%s968_s5 + $0x58] sm:$0xff]   ;;  %v816_v11 = vld [vmem:[%s968_s5 + $0x60] sm:$0xff]   ;;  %v818_v13 = vld [vmem:[%s968_s5 + $0x68] sm:$0xff]  }
  0x1c   : > { %748 = vmatprep.mubr.msk.bf16.mxu1 %vm308_vm0, %v812_v7  ;;  %v819_v14 = vld [vmem:[%s968_s5 + $0x30] sm:$0xff]   ;;  %v821_v16 = vld [vmem:[%s968_s5 + $0x38] sm:$0xff]   ;;  %p832_p2 = por %p831_p1, %p830_p0 }
  0x1d   : > { %v820_v15 = vld [vmem:[%s968_s5 + $0x70] sm:$0xff]   ;;  %v822_v17 = vld [vmem:[%s968_s5 + $0x78] sm:$0xff]  }
  0x1e   : > { %p833_p3 = pnand %p832_p2, %p826_p13 }
  0x22   : > { %733 = vmatmul.mubr.msk.bf16.gmra.mrb[4].mxu0 %vm308_vm0, %v813_v8 }
  0x23   : > { %749 = vmatmul.mubr.msk.bf16.gmra.mrb[4].mxu1 %vm308_vm0, %v814_v9  ;;  %736 = vmatprep.mubr.msk.bf16.mxu0 %vm308_vm0, %v815_v10 }
  0x24   : > { %752 = vmatprep.mubr.msk.bf16.mxu1 %vm308_vm0, %v816_v11 }
  0x2a   : > { %737 = vmatmul.mubr.msk.bf16.gmra.mrb[8].mxu0 %vm308_vm0, %v817_v12 }
  0x2b   : > { %753 = vmatmul.mubr.msk.bf16.gmra.mrb[8].mxu1 %vm308_vm0, %v818_v13  ;;  %740 = vmatprep.mubr.msk.bf16.mxu0 %vm308_vm0, %v819_v14 }
  0x2c   : > { %756 = vmatprep.mubr.msk.bf16.mxu1 %vm308_vm0, %v820_v15 }
  0x32   : > { %741 = vmatmul.mubr.msk.bf16.gmra.mrb[12].mxu0 %vm308_vm0, %v821_v16 }
  0x33   : > { %757 = vmatmul.mubr.msk.bf16.gmra.mrb[12].mxu1 %vm308_vm0, %v822_v17 }
  0xed   : > { %v730_v19 = vpop.f32.mrb[0].mxu0 }
  0xee   : > { %v400_v20 = vadd.f32 %v730_v19, %v1006_v18  ;;  %v746_v21 = vpop.f32.mrb[0].mxu1  ;;  %v391_v22 = vpop.f32.mrb[1].mxu0 }
  0xef   : > { %v464_v23 = vadd.f32 %v746_v21, %v1006_v18  ;;  %v392_v24 = vadd.f32 %v1006_v18, %v391_v22  ;;  %v455_v25 = vpop.f32.mrb[1].mxu1  ;;  %v731_v26 = vpop.f32.mrb[2].mxu0 }
  0xf0   : > { %v520_v27 = vmax.f32 %v400_v20, 0.0  ;;  %v456_v28 = vadd.f32 %v1006_v18, %v455_v25  ;;  %v403_v29 = vadd.f32 %v731_v26, %v1006_v18  ;;  %v747_v30 = vpop.f32.mrb[2].mxu1  ;;  %v394_v31 = vpop.f32.mrb[3].mxu0 }
  0xf1   : > { %v536_v32 = vmax.f32 %v464_v23, 0.0  ;;  %v518_v33 = vmax.f32 %v392_v24, 0.0  ;;  %v467_v34 = vadd.f32 %v747_v30, %v1006_v18  ;;  %v395_v35 = vadd.f32 %v1006_v18, %v394_v31  ;;  %v458_v36 = vpop.f32.mrb[3].mxu1 }
  0xf2   : > { %552 = vst [vmem:[%s1017_s10 + $0x10] sm:$0xff] %v520_v27  ;;  %v534_v37 = vmax.f32 %v456_v28, 0.0  ;;  %v521_v38 = vmax.f32 %v403_v29, 0.0  ;;  %v459_v39 = vadd.f32 %v1006_v18, %v458_v36 }
  0xf3   : > { %568 = vst [vmem:[%s1017_s10 + $0x90] sm:$0xff] %v536_v32  ;;  %550 = vst [vmem:[%s1017_s10] sm:$0xff] %v518_v33  ;;  %v537_v40 = vmax.f32 %v467_v34, 0.0  ;;  %v519_v41 = vmax.f32 %v395_v35, 0.0 }
  0xf4   : > { %566 = vst [vmem:[%s1017_s10 + $0x80] sm:$0xff] %v534_v37  ;;  %553 = vst [vmem:[%s1017_s10 + $0x18] sm:$0xff] %v521_v38  ;;  %v535_v42 = vmax.f32 %v459_v39, 0.0 }
  0xf5   : > { %569 = vst [vmem:[%s1017_s10 + $0x98] sm:$0xff] %v537_v40  ;;  %551 = vst [vmem:[%s1017_s10 + $0x8] sm:$0xff] %v519_v41  ;;  %v734_v43 = vpop.f32.mrb[4].mxu0 }
  0xf6   : > { %567 = vst [vmem:[%s1017_s10 + $0x88] sm:$0xff] %v535_v42  ;;  %v416_v44 = vadd.f32 %v734_v43, %v1006_v18  ;;  %v750_v45 = vpop.f32.mrb[4].mxu1  ;;  %v407_v46 = vpop.f32.mrb[5].mxu0 }
  0xf7   : > { %v480_v47 = vadd.f32 %v750_v45, %v1006_v18  ;;  %v408_v48 = vadd.f32 %v1006_v18, %v407_v46  ;;  %v471_v49 = vpop.f32.mrb[5].mxu1  ;;  %v735_v50 = vpop.f32.mrb[6].mxu0 }
  0xf8   : > { %v524_v51 = vmax.f32 %v416_v44, 0.0  ;;  %v472_v52 = vadd.f32 %v1006_v18, %v471_v49  ;;  %v419_v53 = vadd.f32 %v735_v50, %v1006_v18  ;;  %v751_v54 = vpop.f32.mrb[6].mxu1  ;;  %v410_v55 = vpop.f32.mrb[7].mxu0 }
  0xf9   : > { %v540_v56 = vmax.f32 %v480_v47, 0.0  ;;  %v522_v57 = vmax.f32 %v408_v48, 0.0  ;;  %v483_v58 = vadd.f32 %v751_v54, %v1006_v18  ;;  %v411_v59 = vadd.f32 %v1006_v18, %v410_v55  ;;  %v474_v60 = vpop.f32.mrb[7].mxu1 }
  0xfa   : > { %556 = vst [vmem:[%s1017_s10 + $0x30] sm:$0xff] %v524_v51  ;;  %v538_v61 = vmax.f32 %v472_v52, 0.0  ;;  %v525_v62 = vmax.f32 %v419_v53, 0.0  ;;  %v475_v63 = vadd.f32 %v1006_v18, %v474_v60 }
  0xfb   : > { %572 = vst [vmem:[%s1017_s10 + $0xb0] sm:$0xff] %v540_v56  ;;  %554 = vst [vmem:[%s1017_s10 + $0x20] sm:$0xff] %v522_v57  ;;  %v541_v0 = vmax.f32 %v483_v58, 0.0  ;;  %v523_v1 = vmax.f32 %v411_v59, 0.0 }
  0xfc   : > { %570 = vst [vmem:[%s1017_s10 + $0xa0] sm:$0xff] %v538_v61  ;;  %557 = vst [vmem:[%s1017_s10 + $0x38] sm:$0xff] %v525_v62  ;;  %v539_v2 = vmax.f32 %v475_v63, 0.0 }
  0xfd   : > { %573 = vst [vmem:[%s1017_s10 + $0xb8] sm:$0xff] %v541_v0  ;;  %555 = vst [vmem:[%s1017_s10 + $0x28] sm:$0xff] %v523_v1  ;;  %v738_v3 = vpop.f32.mrb[8].mxu0 }
  0xfe   : > { %571 = vst [vmem:[%s1017_s10 + $0xa8] sm:$0xff] %v539_v2  ;;  %v432_v4 = vadd.f32 %v738_v3, %v1006_v18  ;;  %v754_v5 = vpop.f32.mrb[8].mxu1  ;;  %v423_v6 = vpop.f32.mrb[9].mxu0 }
  0xff   : > { %v496_v7 = vadd.f32 %v754_v5, %v1006_v18  ;;  %v424_v8 = vadd.f32 %v1006_v18, %v423_v6  ;;  %v487_v9 = vpop.f32.mrb[9].mxu1  ;;  %v739_v10 = vpop.f32.mrb[10].mxu0 }
 0x100   : > { %v528_v11 = vmax.f32 %v432_v4, 0.0  ;;  %v488_v12 = vadd.f32 %v1006_v18, %v487_v9  ;;  %v435_v13 = vadd.f32 %v739_v10, %v1006_v18  ;;  %v755_v14 = vpop.f32.mrb[10].mxu1  ;;  %v426_v15 = vpop.f32.mrb[11].mxu0 }
 0x101   : > { %v544_v16 = vmax.f32 %v496_v7, 0.0  ;;  %v526_v17 = vmax.f32 %v424_v8, 0.0  ;;  %v499_v19 = vadd.f32 %v755_v14, %v1006_v18  ;;  %v427_v20 = vadd.f32 %v1006_v18, %v426_v15  ;;  %v490_v21 = vpop.f32.mrb[11].mxu1 }
 0x102   : > { %560 = vst [vmem:[%s1017_s10 + $0x50] sm:$0xff] %v528_v11  ;;  %v542_v22 = vmax.f32 %v488_v12, 0.0  ;;  %v529_v23 = vmax.f32 %v435_v13, 0.0  ;;  %v491_v24 = vadd.f32 %v1006_v18, %v490_v21 }
 0x103   : > { %576 = vst [vmem:[%s1017_s10 + $0xd0] sm:$0xff] %v544_v16  ;;  %558 = vst [vmem:[%s1017_s10 + $0x40] sm:$0xff] %v526_v17  ;;  %v545_v25 = vmax.f32 %v499_v19, 0.0  ;;  %v527_v26 = vmax.f32 %v427_v20, 0.0 }
 0x104   : > { %574 = vst [vmem:[%s1017_s10 + $0xc0] sm:$0xff] %v542_v22  ;;  %561 = vst [vmem:[%s1017_s10 + $0x58] sm:$0xff] %v529_v23  ;;  %v543_v27 = vmax.f32 %v491_v24, 0.0 }
 0x105   : > { %577 = vst [vmem:[%s1017_s10 + $0xd8] sm:$0xff] %v545_v25  ;;  %559 = vst [vmem:[%s1017_s10 + $0x48] sm:$0xff] %v527_v26  ;;  %v742_v28 = vpop.f32.mrb[12].mxu0 }
 0x106   : > { %575 = vst [vmem:[%s1017_s10 + $0xc8] sm:$0xff] %v543_v27  ;;  %v448_v29 = vadd.f32 %v742_v28, %v1006_v18  ;;  %v758_v30 = vpop.f32.mrb[12].mxu1  ;;  %v439_v31 = vpop.f32.mrb[13].mxu0 }
 0x107   : > { %v512_v32 = vadd.f32 %v758_v30, %v1006_v18  ;;  %v440_v33 = vadd.f32 %v1006_v18, %v439_v31  ;;  %v503_v34 = vpop.f32.mrb[13].mxu1  ;;  %v743_v35 = vpop.f32.mrb[14].mxu0 }
 0x108   : > { %v532_v36 = vmax.f32 %v448_v29, 0.0  ;;  %v504_v37 = vadd.f32 %v1006_v18, %v503_v34  ;;  %v451_v38 = vadd.f32 %v743_v35, %v1006_v18  ;;  %v759_v39 = vpop.f32.mrb[14].mxu1  ;;  %v442_v40 = vpop.f32.mrb[15].mxu0 }
 0x109   : > { %v548_v41 = vmax.f32 %v512_v32, 0.0  ;;  %v530_v42 = vmax.f32 %v440_v33, 0.0  ;;  %v515_v43 = vadd.f32 %v759_v39, %v1006_v18  ;;  %v443_v44 = vadd.f32 %v1006_v18, %v442_v40  ;;  %v506_v45 = vpop.f32.mrb[15].mxu1 }
 0x10a   : > { %564 = vst [vmem:[%s1017_s10 + $0x70] sm:$0xff] %v532_v36  ;;  %v546_v46 = vmax.f32 %v504_v37, 0.0  ;;  %v533_v47 = vmax.f32 %v451_v38, 0.0  ;;  %v507_v48 = vadd.f32 %v1006_v18, %v506_v45 }
 0x10b   : > { %580 = vst [vmem:[%s1017_s10 + $0xf0] sm:$0xff] %v548_v41  ;;  %562 = vst [vmem:[%s1017_s10 + $0x60] sm:$0xff] %v530_v42  ;;  %v549_v49 = vmax.f32 %v515_v43, 0.0  ;;  %v531_v50 = vmax.f32 %v443_v44, 0.0 }
 0x10c   : > { %578 = vst [vmem:[%s1017_s10 + $0xe0] sm:$0xff] %v546_v46  ;;  %565 = vst [vmem:[%s1017_s10 + $0x78] sm:$0xff] %v533_v47  ;;  %v547_v51 = vmax.f32 %v507_v48, 0.0 }
 0x10d   : > { %581 = vst [vmem:[%s1017_s10 + $0xf8] sm:$0xff] %v549_v49  ;;  %563 = vst [vmem:[%s1017_s10 + $0x68] sm:$0xff] %v531_v50 }
 0x10e   : > { %579 = vst [vmem:[%s1017_s10 + $0xe8] sm:$0xff] %v547_v51 }
 0x10f   : > { %836 = shalt.err (!%p833_p3)
}
 0x110   : > { %s837_s29 = scalar_lea.hbm %s1076_s20, 4096  ;;  %s841_s5 = scalar_lea.hbm %s1131_s3, 16384 }
 0x111   : > { %p838_p4 = scmp.ne.s32.totalorder %s1076_s20, %s837_s29  ;;  %p842_p9 = scmp.lt.u32.totalorder %s1076_s20, %s1131_s3 }
 0x112   : > { %p843_p10 = scmp.lt.u32.totalorder %s841_s5, %s837_s29  ;;  %p845_p12 = scmp.lt.u32.totalorder %s837_s29, %s1076_s20 }
 0x113   : > { %p839_p7 = pnand %p838_p4, %p948_p5 }
 0x114   : > { %p844_p11 = por %p843_p10, %p842_p9 }
 0x115   : > { %p840_p8 = pneg %p839_p7 }
 0x116   : > { %p846_p13 = por %p845_p12, %p844_p11 }
 0x118   : > { %p847_p0 = pnand %p846_p13, %p840_p8 }
 0x11a   : > { %850 = shalt.err (!%p847_p0)
}
 0x11b   : > { %s888_s8 = smov 128   ;;  %s889_s9 = smov 8  }
 0x11c   : > { %764 = dma.vmem_to_hbm [thread:$0]  (%p948_p5), %s1078_s17, 4096, %s1076_s20, %s1087_s24, %s888_s8, %s888_s8, %s889_s9  }
 0x11d PF: > { %p770_p1 = scmp.ge.s32.totalorder %s885_s15, 2  ;;  %s611_s10 = sand.u32 1, %s873_s12  }
 0x11e   : > { %s612_s11 = scalar_lea.sflag [#allocation3], %s611_s10 }
 0x11f   : > { %p767_p2 = pnand %p770_p1, %p952_p6 }
 0x121   : > { %868 = dma.done.wait (!%p767_p2), %s612_s11, 4096  }
 0x122   : > { %870 = vsyncadd (!%p767_p2), %s612_s11, 4294963200  ;;  %p13_p3 = scmp.ge.s32.totalorder %s935_s18, 6   ;;  %s1134_s12 = smov %s877_s13 }
 0x123   : > { %s1135_s13 = smov %s881_s14  ;;  %s1136_s14 = smov %s946_s21 }
 0x124   : > { %s1137_s15 = smov %s935_s18  ;;  %15 = sbr.rel (!%p13_p3) target bundleno = 3 (0x3), region = 67 }
 0x12b   :  { %617 = vsyncpa [#allocation3], 1 }
 0x12c   :  { %619 = vsyncpa [#allocation3 + $0x1], 1 }

</bundles_post_ra>
